<compile_context>
chip_gen: v7x
topology: tpu7x:2x2x1
jax: 0.10.0
libtpu: 0.0.40
codegen_flags: <defaults>
</compile_context>

<pallas_src>
import jax
import jax.numpy as jnp
from jax.experimental import pallas as pl
from jax.experimental.pallas import tpu as pltpu


def _round_up(x, m):
    return ((x + m - 1) // m) * m


def actor_kernel(xT_ref, w1_ref, b1_ref, w2_ref, b2_ref, w3_ref, b3_ref, o_ref):
    # Feature-major activations: (features, tile_b); batch sits on the 128-lane axis.
    xT = xT_ref[...]                                                    # (in, TB) bf16

    # layer 1: (64, in) @ (in, TB) -> (64, TB); bf16 MXU operands, f32 accumulate.
    h1 = jnp.dot(w1_ref[...], xT, preferred_element_type=jnp.float32) + b1_ref[...]
    h1 = jnp.maximum(h1, 0.0)

    # layer 2: (32, 64) @ (64, TB) -> (32, TB); f32 activations (no downcast pass).
    h2 = jnp.dot(w2_ref[...], h1, preferred_element_type=jnp.float32) + b2_ref[...]
    h2 = jnp.maximum(h2, 0.0)

    # layer 3 (logits): (out, 32) @ (32, TB) -> (out, TB)
    logits = jnp.dot(w3_ref[...], h2, preferred_element_type=jnp.float32) + b3_ref[...]

    # numerically-stable softmax over the feature (sublane) axis, exact normalization.
    m = jnp.max(logits, axis=0, keepdims=True)
    e = jnp.exp(logits - m)
    denom = jnp.sum(e, axis=0, keepdims=True)
    o_ref[...] = (e / denom).astype(o_ref.dtype)


def actor_forward(x, params, *, tile_b=8192):
    """x: (B, in_dim) float32.  params: PyTorch-layout weights (out, in) + biases (out,)."""
    w1, b1 = params["w1"], params["b1"]
    w2, b2 = params["w2"], params["b2"]
    w3, b3 = params["w3"], params["b3"]

    B, in_dim = x.shape
    out_dim = w3.shape[0]

    # Batch tile: multiple of 128 (lane width); keep >= 2 grid steps whenever the
    # batch allows (v7x megacore), never exceed the (lane-padded) batch.
    tile_b = max(128, _round_up(tile_b, 128))
    tile_b = min(tile_b, _round_up(pl.cdiv(B, 2), 128))

    # Pad batch only to the 128-lane boundary -> single fused transpose+cast(+pad)
    # pass over x.  Ragged last grid blocks are handled by Pallas (clipped DMA in,
    # masked store out); padded columns are discarded by the final slice.
    b_pad = _round_up(B, 128)
    n_tiles = pl.cdiv(b_pad, tile_b)

    xT = x.T.astype(jnp.bfloat16)                       # (in_dim, B), feature-major
    if b_pad != B:
        xT = jnp.pad(xT, ((0, 0), (0, b_pad - B)))

    # Layer-1 operands bf16 for the MXU; layers 2/3 stay f32 (tiny weights).
    w1b = w1.astype(jnp.bfloat16)
    w2f = w2.astype(jnp.float32)
    w3f = w3.astype(jnp.float32)
    b1c = b1.reshape(-1, 1).astype(jnp.float32)
    b2c = b2.reshape(-1, 1).astype(jnp.float32)
    b3c = b3.reshape(-1, 1).astype(jnp.float32)

    resident = lambda a: pl.BlockSpec(a.shape, lambda i: (0, 0))  # DMA'd once, stays in VMEM

    out_T = pl.pallas_call(
        actor_kernel,
        out_shape=jax.ShapeDtypeStruct((out_dim, b_pad), jnp.float32),
        grid=(n_tiles,),
        in_specs=[
            pl.BlockSpec((in_dim, tile_b), lambda i: (0, i)),   # streamed, double-buffered x tile
            resident(w1b), resident(b1c),
            resident(w2f), resident(b2c),
            resident(w3f), resident(b3c),
        ],
        out_specs=pl.BlockSpec((out_dim, tile_b), lambda i: (0, i)),  # lane-dense output
        compiler_params=pltpu.CompilerParams(
            dimension_semantics=("parallel",),        # megacore sharding on v7x
            vmem_limit_bytes=32 * 1024 * 1024,        # explicit; fits all generations
        ),
    )(xT, w1b, b1c, w2f, b2c, w3f, b3c)

    # Back to batch-major (B, out_dim), dropping the lane padding (tiny: out_dim x B).
    return out_T[:, :B].T


def init_params(key, in_dim, out_dim):
    """Deterministic synthetic init (uniform like PyTorch's default Linear init).
    Weights stored PyTorch-style: (out_features, in_features)."""
    ks = jax.random.split(key, 6)

    def lin_init(kw, kb, fan_in, fan_out):
        bound = 1.0 / jnp.sqrt(fan_in)
        w = jax.random.uniform(kw, (fan_out, fan_in), jnp.float32, -bound, bound)
        b = jax.random.uniform(kb, (fan_out,), jnp.float32, -bound, bound)
        return w, b

    w1, b1 = lin_init(ks[0], ks[1], in_dim, 64)
    w2, b2 = lin_init(ks[2], ks[3], 64, 32)
    w3, b3 = lin_init(ks[4], ks[5], 32, out_dim)
    return {"w1": w1, "b1": b1, "w2": w2, "b2": b2, "w3": w3, "b3": b3}


def actor_ref(x, params):
    """Pure-JAX f32 reference of the PyTorch forward, for correctness checking."""
    h = jnp.maximum(x @ params["w1"].T + params["b1"], 0.0)
    h = jnp.maximum(h @ params["w2"].T + params["b2"], 0.0)
    logits = h @ params["w3"].T + params["b3"]
    return jax.nn.softmax(logits, axis=-1)


if __name__ == "__main__":
    key = jax.random.PRNGKey(0)
    k_in, k_par, k_in2 = jax.random.split(key, 3)

    in_dim, out_dim = 8, 4
    params = init_params(k_par, in_dim, out_dim)

    # Small canonical case (matches module spec scale).
    batch = 2
    x = jax.random.normal(k_in, (batch, in_dim), jnp.float32)
    out = actor_forward(x, params)
    jax.block_until_ready(out)
    ref = actor_ref(x, params)
    assert out.shape == (batch, out_dim)
    # bf16 input / layer-1 weight on the MXU -> loose-ish tolerance vs f32 ref.
    assert jnp.allclose(out, ref, atol=2e-2, rtol=2e-2)
    # exact softmax normalization -> rows sum to 1 (up to f32 rounding)
    assert jnp.allclose(jnp.sum(out, axis=-1), 1.0, atol=1e-4)

    # Second case exercising multi-tile grid + ragged last block + lane padding.
    batch2 = 300
    x2 = jax.random.normal(k_in2, (batch2, in_dim), jnp.float32)
    out2 = actor_forward(x2, params, tile_b=256)
    jax.block_until_ready(out2)
    ref2 = actor_ref(x2, params)
    assert out2.shape == (batch2, out_dim)
    assert jnp.allclose(out2, ref2, atol=2e-2, rtol=2e-2)
    assert jnp.allclose(jnp.sum(out2, axis=-1), 1.0, atol=1e-4)

    print("KERNEL_OK")
</pallas_src>

<mosaic_0001>
module attributes {stable_mosaic.version = 11 : i64} {
  func.func @actor_kernel(%arg0: i32, %arg1: memref<8x128xbf16, #tpu.memory_space<vmem>>, %arg2: memref<64x8xbf16, #tpu.memory_space<vmem>>, %arg3: memref<64x1xf32, #tpu.memory_space<vmem>>, %arg4: memref<32x64xf32, #tpu.memory_space<vmem>>, %arg5: memref<32x1xf32, #tpu.memory_space<vmem>>, %arg6: memref<4x32xf32, #tpu.memory_space<vmem>>, %arg7: memref<4x1xf32, #tpu.memory_space<vmem>>, %arg8: memref<4x128xf32, #tpu.memory_space<vmem>>) attributes {dimension_semantics = [#tpu.dimension_semantics<parallel>], iteration_bounds = array<i64: 1>, scalar_prefetch = 0 : i64, scratch_operands = 0 : i64, tpu.core_type = #tpu.core_type<tc>, window_params = [{transform_indices = @transform_0, window_bounds = array<i64: 8, 128>}, {pipeline_mode = #tpu.pipeline_mode<synchronous>, transform_indices = @transform_1, window_bounds = array<i64: 64, 8>}, {pipeline_mode = #tpu.pipeline_mode<synchronous>, transform_indices = @transform_2, window_bounds = array<i64: 64, 1>}, {pipeline_mode = #tpu.pipeline_mode<synchronous>, transform_indices = @transform_3, window_bounds = array<i64: 32, 64>}, {pipeline_mode = #tpu.pipeline_mode<synchronous>, transform_indices = @transform_4, window_bounds = array<i64: 32, 1>}, {pipeline_mode = #tpu.pipeline_mode<synchronous>, transform_indices = @transform_5, window_bounds = array<i64: 4, 32>}, {pipeline_mode = #tpu.pipeline_mode<synchronous>, transform_indices = @transform_6, window_bounds = array<i64: 4, 1>}, {transform_indices = @transform_7, window_bounds = array<i64: 4, 128>}]} {
    %c0 = arith.constant 0 : index
    %c0_0 = arith.constant 0 : index
    %0 = vector.load %arg1[%c0, %c0_0] : memref<8x128xbf16, #tpu.memory_space<vmem>>, vector<8x128xbf16>
    %c0_1 = arith.constant 0 : index
    %c0_2 = arith.constant 0 : index
    %1 = vector.load %arg2[%c0_1, %c0_2] : memref<64x8xbf16, #tpu.memory_space<vmem>>, vector<64x8xbf16>
    %cst = arith.constant dense<0.000000e+00> : vector<64x128xf32>
    %2 = tpu.matmul %1, %0, %cst {dimension_numbers = #tpu.dot_dimension_numbers<[1], [0], [0], [1], [0, 0, 1, 1], [], []>} : vector<64x8xbf16>, vector<8x128xbf16>, vector<64x128xf32> -> vector<64x128xf32>
    %c0_3 = arith.constant 0 : index
    %c0_4 = arith.constant 0 : index
    %3 = vector.load %arg3[%c0_3, %c0_4] : memref<64x1xf32, #tpu.memory_space<vmem>>, vector<64x1xf32>
    %4 = vector.broadcast %3 : vector<64x1xf32> to vector<64x128xf32>
    %5 = arith.addf %2, %4 : vector<64x128xf32>
    %cst_5 = arith.constant 0.000000e+00 : f32
    %6 = vector.broadcast %cst_5 : f32 to vector<64x128xf32>
    %7 = arith.maximumf %5, %6 : vector<64x128xf32>
    %c0_6 = arith.constant 0 : index
    %c0_7 = arith.constant 0 : index
    %8 = vector.load %arg4[%c0_6, %c0_7] : memref<32x64xf32, #tpu.memory_space<vmem>>, vector<32x64xf32>
    %cst_8 = arith.constant dense<0.000000e+00> : vector<32x128xf32>
    %9 = tpu.matmul %8, %7, %cst_8 {dimension_numbers = #tpu.dot_dimension_numbers<[1], [0], [0], [1], [0, 0, 1, 1], [], []>} : vector<32x64xf32>, vector<64x128xf32>, vector<32x128xf32> -> vector<32x128xf32>
    %c0_9 = arith.constant 0 : index
    %c0_10 = arith.constant 0 : index
    %10 = vector.load %arg5[%c0_9, %c0_10] : memref<32x1xf32, #tpu.memory_space<vmem>>, vector<32x1xf32>
    %11 = vector.broadcast %10 : vector<32x1xf32> to vector<32x128xf32>
    %12 = arith.addf %9, %11 : vector<32x128xf32>
    %cst_11 = arith.constant 0.000000e+00 : f32
    %13 = vector.broadcast %cst_11 : f32 to vector<32x128xf32>
    %14 = arith.maximumf %12, %13 : vector<32x128xf32>
    %c0_12 = arith.constant 0 : index
    %c0_13 = arith.constant 0 : index
    %15 = vector.load %arg6[%c0_12, %c0_13] : memref<4x32xf32, #tpu.memory_space<vmem>>, vector<4x32xf32>
    %cst_14 = arith.constant dense<0.000000e+00> : vector<4x128xf32>
    %16 = tpu.matmul %15, %14, %cst_14 {dimension_numbers = #tpu.dot_dimension_numbers<[1], [0], [0], [1], [0, 0, 1, 1], [], []>} : vector<4x32xf32>, vector<32x128xf32>, vector<4x128xf32> -> vector<4x128xf32>
    %c0_15 = arith.constant 0 : index
    %c0_16 = arith.constant 0 : index
    %17 = vector.load %arg7[%c0_15, %c0_16] : memref<4x1xf32, #tpu.memory_space<vmem>>, vector<4x1xf32>
    %18 = vector.broadcast %17 : vector<4x1xf32> to vector<4x128xf32>
    %19 = arith.addf %16, %18 : vector<4x128xf32>
    %cst_17 = arith.constant dense<0xFF800000> : vector<128xf32>
    %20 = vector.multi_reduction <maximumf>, %19, %cst_17 [0] : vector<4x128xf32> to vector<128xf32>
    %21 = vector.shape_cast %20 : vector<128xf32> to vector<1x128xf32>
    %22 = vector.broadcast %21 : vector<1x128xf32> to vector<4x128xf32>
    %23 = arith.subf %19, %22 : vector<4x128xf32>
    %24 = math.exp %23 : vector<4x128xf32>
    %cst_18 = arith.constant dense<0.000000e+00> : vector<128xf32>
    %25 = vector.multi_reduction <add>, %24, %cst_18 [0] : vector<4x128xf32> to vector<128xf32>
    %26 = vector.shape_cast %25 : vector<128xf32> to vector<1x128xf32>
    %27 = vector.broadcast %26 : vector<1x128xf32> to vector<4x128xf32>
    %28 = arith.divf %24, %27 : vector<4x128xf32>
    %c0_19 = arith.constant 0 : index
    %c0_20 = arith.constant 0 : index
    %29 = vector.load %arg8[%c0_19, %c0_20] : memref<4x128xf32, #tpu.memory_space<vmem>>, vector<4x128xf32>
    tpu.vector_store %arg8[%c0_19, %c0_20], %28 {strides = array<i32>} : memref<4x128xf32, #tpu.memory_space<vmem>>, vector<4x128xf32>,
    return
  }
  func.func @transform_0(%arg0: i32) -> (i32, i32) {
    %c0_i32 = arith.constant 0 : i32
    %c0_i32_0 = arith.constant 0 : i32
    return %c0_i32, %arg0 : i32, i32
  }
  func.func @transform_1(%arg0: i32) -> (i32, i32) {
    %c0_i32 = arith.constant 0 : i32
    %c0_i32_0 = arith.constant 0 : i32
    %c0_i32_1 = arith.constant 0 : i32
    return %c0_i32, %c0_i32_0 : i32, i32
  }
  func.func @transform_2(%arg0: i32) -> (i32, i32) {
    %c0_i32 = arith.constant 0 : i32
    %c0_i32_0 = arith.constant 0 : i32
    %c0_i32_1 = arith.constant 0 : i32
    return %c0_i32, %c0_i32_0 : i32, i32
  }
  func.func @transform_3(%arg0: i32) -> (i32, i32) {
    %c0_i32 = arith.constant 0 : i32
    %c0_i32_0 = arith.constant 0 : i32
    %c0_i32_1 = arith.constant 0 : i32
    return %c0_i32, %c0_i32_0 : i32, i32
  }
  func.func @transform_4(%arg0: i32) -> (i32, i32) {
    %c0_i32 = arith.constant 0 : i32
    %c0_i32_0 = arith.constant 0 : i32
    %c0_i32_1 = arith.constant 0 : i32
    return %c0_i32, %c0_i32_0 : i32, i32
  }
  func.func @transform_5(%arg0: i32) -> (i32, i32) {
    %c0_i32 = arith.constant 0 : i32
    %c0_i32_0 = arith.constant 0 : i32
    %c0_i32_1 = arith.constant 0 : i32
    return %c0_i32, %c0_i32_0 : i32, i32
  }
  func.func @transform_6(%arg0: i32) -> (i32, i32) {
    %c0_i32 = arith.constant 0 : i32
    %c0_i32_0 = arith.constant 0 : i32
    %c0_i32_1 = arith.constant 0 : i32
    return %c0_i32, %c0_i32_0 : i32, i32
  }
  func.func @transform_7(%arg0: i32) -> (i32, i32) {
    %c0_i32 = arith.constant 0 : i32
    %c0_i32_0 = arith.constant 0 : i32
    return %c0_i32, %arg0 : i32, i32
  }
}

</mosaic_0001>

<bundles_post_ra>
// kernel: tpu_custom_call.1
= control target key start
LH: loop header
LB: loop body
LE: loop exit
PB: predicated region body
PF: predicated region fallthrough
CT: control target
= control target key end

     0   :  { %vm118_vm0 = vcmask 1043456   ;;  %vm105_vm1 = vcmask 64512   ;;  %v580_v5 = vmov 0   ;;  %s718_s0 = inlined_call_operand.vmem [shape: bf16[8,128], index: 0, kind: input, shape index: {}]   ;;  %s719_s1 = inlined_call_operand.vmem [shape: bf16[64,8], index: 1, kind: input, shape index: {}]   ;;  %s720_s2 = inlined_call_operand.vmem [shape: f32[64,1], index: 2, kind: input, shape index: {}]   ;;  %s721_s3 = inlined_call_operand.vmem [shape: f32[32,64], index: 3, kind: input, shape index: {}]   ;;  %s722_s4 = inlined_call_operand.vmem [shape: f32[32,1], index: 4, kind: input, shape index: {}]   ;;  %s723_s5 = inlined_call_operand.vmem [shape: f32[4,32], index: 5, kind: input, shape index: {}]   ;;  %s724_s6 = inlined_call_operand.vmem [shape: f32[4,1], index: 6, kind: input, shape index: {}]   ;;  %s725_s7 = inlined_call_operand.hbm [shape: f32[4,128], index: 7, kind: output, shape index: {}]  }
   0x1   :  { %v28_v0 = vld [vmem:[%s718_s0] sm:$0xf]  ;;  %v549_v3 = vld [vmem:[%s719_s1 + $0x8] sm:$0xff]   ;;  %v550_v4 = vld [vmem:[%s719_s1 + $0x10] sm:$0xff]   ;;  %546 = vset.pattern.permute.xlu0 %v580_v5  ;;  %547 = vset.pattern.permute.xlu1 %v580_v5 }
   0x2   :  { %v548_v1 = vld [vmem:[%s719_s1] sm:$0xff]   ;;  %540 = vmatprep.subr.msk.bf16.mxu0 %vm118_vm0, %v28_v0  ;;  %v120_v2 = vsel %vm118_vm0, %v28_v0, 0  ;;  %v39_v7 = vld [vmem:[%s720_s2 + $0x10] sm:$0xff]  ;;  %v38_v8 = vld [vmem:[%s720_s2 + $0x8] sm:$0xff] }
   0x3   :  { %476 = vmatpush3.bf16.msra.mxu0 %v120_v2  ;;  %477 = vmatprep.mubr.msk.bf16.mxu0 %vm105_vm1, %v548_v1  ;;  %v37_v6 = vld [vmem:[%s720_s2] sm:$0xff]  ;;  %v40_v9 = vld [vmem:[%s720_s2 + $0x18] sm:$0xff] }
   0x4   :  { %47 = vperm.xlu0 %546, %v37_v6   ;;  %57 = vperm.xlu1 %547, %v39_v7   ;;  %v551_v10 = vld [vmem:[%s719_s1 + $0x18] sm:$0xff]  }
   0x6   :  { %478 = vmatmul.mubr.msk.bf16.vlgmr.msra.gmra.mrb[0].mxu0 %vm105_vm1, %v549_v3 }
   0x7   :  { %481 = vmatprep.mubr.msk.bf16.mxu0 %vm105_vm1, %v550_v4 }
   0x8   :  { %52 = vperm.xlu0 %546, %v38_v8  }
   0x9   :  { %12 = vsyncpa [#allocation3], 0  ;;  %v41_v11 = vld [vmem:[%s720_s2 + $0x20] sm:$0xff]  ;;  %62 = vperm.xlu1 %547, %v40_v9   ;;  %v42_v12 = vld [vmem:[%s720_s2 + $0x28] sm:$0xff]  ;;  %vm223_vm2 = vcmask 523264   ;;  %v581_v60 = vmov 0.0|0.0  }
   0xa   :  { %v43_v13 = vld [vmem:[%s720_s2 + $0x30] sm:$0xff]  ;;  %v44_v14 = vld [vmem:[%s720_s2 + $0x38] sm:$0xff]  ;;  %v199_v15 = vld [vmem:[%s722_s4] sm:$0xff]  ;;  %534 = vmatprep.subr.bf16.mxu0 %v581_v60  ;;  %vm582_vm3 = vmmov 0   ;;  %v583_v61 = vmov 0.0   ;;  %vm332_vm4 = vcmask 261120  }
   0xb   :  { %v200_v16 = vld [vmem:[%s722_s4 + $0x8] sm:$0xff]  ;;  %v201_v17 = vld [vmem:[%s722_s4 + $0x10] sm:$0xff]  ;;  %v202_v18 = vld [vmem:[%s722_s4 + $0x18] sm:$0xff] }
   0xc   :  { %67 = vperm.xlu0 %546, %v41_v11   ;;  %v326_v19 = vld [vmem:[%s724_s6] sm:$0xf]  ;;  %v196_v57 = vld [vmem:[%s721_s3 + $0x8] sm:$0xff]  ;;  %v197_v58 = vld [vmem:[%s721_s3 + $0x10] sm:$0xff] }
   0xd   :  { %72 = vperm.xlu1 %547, %v42_v12   ;;  %v195_v20 = vld [vmem:[%s721_s3] sm:$0xff]  ;;  %v198_v59 = vld [vmem:[%s721_s3 + $0x18] sm:$0xff] }
   0xe   :  { %482 = vmatmul.mubr.msk.bf16.gmra.mrb[4].mxu0 %vm105_vm1, %v551_v10  ;;  %501 = vmatprep.mubr.msk.f32.mxu1 %vm223_vm2, %v195_v20 }
   0xf   :  { %515 = vmatprep.mubr.msk.f32.mxu0 %vm582_vm3, %v583_v61 }
  0x10   :  { %77 = vperm.xlu0 %546, %v43_v13  }
  0x11   :  { %82 = vperm.xlu1 %547, %v44_v14  }
  0x14   :  { %205 = vperm.xlu0 %546, %v199_v15  }
  0x15   :  { %210 = vperm.xlu1 %547, %v200_v16   ;;  %v325_v16 = vld [vmem:[%s723_s5] sm:$0xf]  ;;  %s584_s5 = smov [#allocation2]  }
  0x16   :  { %s432_s17 = sshll.u32 %s584_s5, 4  ;;  %s433_s17 = int_to_ptr.vmem [resolvable:$true] %s432_s17 }
  0x17   :  { %s556_s18 = scalar_lea.vmem %s433_s17, 64  ;;  %p561_p1 = scmp.lt.s32.totalorder %s433_s17, %s433_s17 }
  0x18   :  { %215 = vperm.xlu0 %546, %v201_v17   ;;  %p557_p0 = scmp.ne.s32.totalorder %s433_s17, %s556_s18  ;;  %p562_p2 = scmp.lt.s32.totalorder %s556_s18, %s556_s18 }
  0x19   :  { %220 = vperm.xlu1 %547, %v202_v18  }
  0x1a   :  { %p563_p3 = por %p562_p2, %p561_p1 }
  0x1c   :  { %329 = vperm.xlu0 %546, %v326_v19   ;;  %p564_p4 = pnand %p563_p3, %p557_p0 }
  0x83   :  { %v48_v21 = vpop.permute.xlu0 %47  ;;  %v58_v22 = vpop.permute.xlu1 %57 }
  0x87   :  { %v53_v23 = vpop.permute.xlu0 %52 }
  0x88   :  { %v63_v24 = vpop.permute.xlu1 %62 }
  0x8b   :  { %v68_v28 = vpop.permute.xlu0 %67 }
  0x8c   :  { %v73_v33 = vpop.permute.xlu1 %72 }
  0x8f   :  { %v78_v40 = vpop.permute.xlu0 %77 }
  0x90   :  { %v83_v45 = vpop.permute.xlu1 %82 }
  0x93   :  { %v206_v63 = vpop.permute.xlu0 %205 }
  0x94   :  { %v211_v62 = vpop.permute.xlu1 %210 }
  0x97   :  { %v216_v8 = vpop.permute.xlu0 %215 }
  0x98   :  { %v221_v5 = vpop.permute.xlu1 %220 }
  0x9b   :  { %v330_v17 = vpop.permute.xlu0 %329 }
  0xd9   :  { %v479_v25 = vpop.f32.mrb[0].mxu0 }
  0xda   :  { %v165_v26 = vadd.f32 %v479_v25, %v58_v22  ;;  %v156_v27 = vpop.f32.mrb[1].mxu0 }
  0xdb   :  { %v157_v29 = vadd.f32 %v156_v27, %v48_v21  ;;  %v480_v30 = vpop.f32.mrb[2].mxu0 }
  0xdc   :  { %v168_v31 = vadd.f32 %v480_v30, %v63_v24  ;;  %v159_v32 = vpop.f32.mrb[3].mxu0  ;;  %v189_v35 = vmax.f32 %v165_v26, 0.0 }
  0xdd   :  { %v160_v34 = vadd.f32 %v159_v32, %v53_v23  ;;  %v187_v37 = vmax.f32 %v157_v29, 0.0 }
  0xde   :  { %v190_v36 = vmax.f32 %v168_v31, 0.0 }
  0xdf   :  { %v188_v38 = vmax.f32 %v160_v34, 0.0 }
  0xe0   :  { %v522_v39 = vpack.c.bf16 %v190_v36, %v189_v35 }
  0xe1   :  { %v483_v41 = vpop.f32.mrb[4].mxu0  ;;  %v518_v42 = vpack.c.bf16 %v188_v38, %v187_v37 }
  0xe2   :  { %v181_v43 = vadd.f32 %v483_v41, %v78_v40  ;;  %v172_v44 = vpop.f32.mrb[5].mxu0 }
  0xe3   :  { %v173_v46 = vadd.f32 %v172_v44, %v68_v28  ;;  %v484_v47 = vpop.f32.mrb[6].mxu0  ;;  %519 = vmatprep.subr.bf16.mxu1 %v518_v42 }
  0xe4   :  { %v184_v48 = vadd.f32 %v484_v47, %v83_v45  ;;  %v175_v49 = vpop.f32.mrb[7].mxu0  ;;  %521 = vmatpush3.bf16.msra.mxu1 %v518_v42  ;;  %v193_v51 = vmax.f32 %v181_v43, 0.0 }
  0xe5   :  { %v176_v50 = vadd.f32 %v175_v49, %v73_v33  ;;  %523 = vmatprep.subr.bf16.mxu1 %v522_v39  ;;  %v191_v53 = vmax.f32 %v173_v46, 0.0 }
  0xe6   :  { %v194_v52 = vmax.f32 %v184_v48, 0.0 }
  0xe7   :  { %v192_v54 = vmax.f32 %v176_v50, 0.0 }
  0xe8   :  { %v530_v55 = vpack.c.bf16 %v194_v52, %v193_v51  ;;  %525 = vmatpush3.bf16.msra.mxu1 %v522_v39 }
  0xe9   :  { %v526_v56 = vpack.c.bf16 %v192_v54, %v191_v53 }
  0xeb   :  { %527 = vmatprep.subr.bf16.mxu1 %v526_v56 }
  0xec   :  { %529 = vmatpush3.bf16.msra.mxu1 %v526_v56 }
  0xed   :  { %531 = vmatprep.subr.bf16.mxu1 %v530_v55 }
  0xf0   :  { %533 = vmatpush3.bf16.msra.mxu1 %v530_v55 }
  0xf3   :  { %502 = vmatmul.mubr.msk.f32.vlgmr.msra.gmra.mrb[0].mxu1 %vm223_vm2, %v196_v57 }
  0xf4   :  { %504 = vmatprep.mubr.msk.f32.mxu1 %vm223_vm2, %v197_v58 }
  0xf7   :  { %505 = vmatmul.mubr.msk.f32.gmra.mrb[2].mxu1 %vm223_vm2, %v198_v59 }
 0x1c6   :  { %v503_v0 = vpop.f32.mrb[0].mxu1 }
 0x1c7   :  { %v308_v1 = vadd.f32 %v503_v0, %v211_v62  ;;  %v302_v2 = vpop.f32.mrb[1].mxu1 }
 0x1c8   :  { %v303_v3 = vadd.f32 %v302_v2, %v206_v63 }
 0x1c9   :  { %v322_v4 = vmax.f32 %v308_v1, 0.0 }
 0x1ca   :  { %v321_v6 = vmax.f32 %v303_v3, 0.0  ;;  %v506_v7 = vpop.f32.mrb[2].mxu1 }
 0x1cb   :  { %v318_v9 = vadd.f32 %v506_v7, %v221_v5  ;;  %v312_v10 = vpop.f32.mrb[3].mxu1 }
 0x1cc   :  { %v535_v11 = vpack.c.bf16 %v322_v4, %v321_v6  ;;  %v313_v12 = vadd.f32 %v312_v10, %v216_v8 }
 0x1cd   :  { %v324_v13 = vmax.f32 %v318_v9, 0.0 }
 0x1ce   :  { %v323_v14 = vmax.f32 %v313_v12, 0.0  ;;  %536 = vmatpush3.bf16.msra.mxu0 %v535_v11 }
 0x1cf   :  { %537 = vmatprep.subr.bf16.mxu0 %v581_v60 }
 0x1d0   :  { %v538_v15 = vpack.c.bf16 %v324_v13, %v323_v14 }
 0x1d2   :  { %539 = vmatpush3.bf16.msra.mxu0 %v538_v15 }
 0x1d5   :  { %516 = vmatmul.mubr.msk.f32.vlgmr.msra.gmra.mrb[8].mxu0 %vm332_vm4, %v325_v16 }
 0x2a8   :  { %v402_v18 = vpop.f32.mrb[8].mxu0 }
 0x2a9   :  { %v403_v19 = vadd.f32 %v402_v18, %v330_v17  ;;  %v517_v20 = vpop.f32.mrb[9].mxu0 }
 0x2ab   :  { %v406_v21 = vsel %vm118_vm0, %v403_v19, -inf }
 0x2ac   :  { %v407_v22 = vrot.slane %v406_v21, 4 }
 0x2ae   :  { %v408_v23 = vmax.f32 %v406_v21, %v407_v22 }
 0x2b0   :  { %v409_v24 = vrot.slane %v408_v23, 2 }
 0x2b2   :  { %v410_v25 = vmax.f32 %v408_v23, %v409_v24 }
 0x2b4   :  { %v411_v26 = vrot.slane %v410_v25, 1 }
 0x2b6   :  { %v412_v27 = vmax.f32 %v410_v25, %v411_v26 }
 0x2b8   :  { %v413_v28 = vsub.f32 %v403_v19, %v412_v27 }
 0x2ba   :  { %v414_v29 = vmul.f32 1.442695, %v413_v28 }
 0x2bc   :  { %552 = vpow2.f32 %v414_v29 }
 0x2c6   :  { %v553_v30 = vpop.eup %552 }
 0x2c7   :  { %v416_v31 = vsel %vm118_vm0, %v553_v30, 0.0 }
 0x2c8   :  { %v417_v32 = vrot.slane %v416_v31, 4 }
 0x2ca   :  { %v418_v33 = vadd.f32 %v417_v32, %v416_v31 }
 0x2cc   :  { %v419_v34 = vrot.slane %v418_v33, 2 }
 0x2ce   :  { %v420_v35 = vadd.f32 %v419_v34, %v418_v33 }
 0x2d0   :  { %v421_v36 = vrot.slane %v420_v35, 1 }
 0x2d2   :  { %v422_v37 = vadd.f32 %v421_v36, %v420_v35 }
 0x2d4   :  { %554 = vrcp.f32 %v422_v37 }
 0x2de   :  { %v555_v38 = vpop.eup %554 }
 0x2df   :  { %v424_v39 = vmul.f32 %v555_v38, %v553_v30 }
 0x2e1   :  { %425 = vst [vmem:[#allocation2] sm:$0xf] %v424_v39 }
 0x2e2   :  { %567 = shalt.err (!%p564_p4)
}
 0x2e3   :  { %s568_s21 = scalar_lea.hbm %s725_s7, 64 }
 0x2e4   :  { %p569_p5 = scmp.ne.s32.totalorder %s725_s7, %s568_s21  ;;  %p572_p6 = scmp.lt.u32.totalorder %s568_s21, %s725_s7 }
 0x2e6   :  { %p574_p7 = pnand %p572_p6, %p569_p5 }
 0x2e8   :  { %577 = shalt.err (!%p574_p7)
}
 0x2e9   :  { %435 = dma.vmem_to_hbm [thread:$0]  %s433_s17, 64, %s725_s7, [#allocation3]  }
 0x2ea   :  { %578 = dma.done.wait [#allocation3], 64  }
 0x2eb   :  { %579 = vsyncadd [#allocation3], 4294967232 }
 0x2ec   :  { %439 = vsyncpa [#allocation3], 1 }

</bundles_post_ra>
